<compile_context>
chip_gen: v5e
topology: v5e:2x2
jax: 0.10.0
libtpu: 0.0.40
codegen_flags: <defaults>
</compile_context>

<pallas_src>
import functools

import jax
import jax.numpy as jnp
from jax.experimental import pallas as pl
from jax.experimental.pallas import tpu as pltpu


def _softplus(x):
    # Numerically-stable softplus, matching torch.nn.functional.softplus to ~1e-9.
    return jnp.maximum(x, 0.0) + jnp.log1p(jnp.exp(-jnp.abs(x)))


def _sample_and_pack_params(params):
    """Reparameterize (mu + softplus(rho) * eps) wrapper-side and pack the four sampled
    tensors into one lane-packed float32 blob of shape (H, D+3):
        columns [0:D]   -> w1   (H, D)
        column  D       -> b1   (H, 1)
        column  D+1     -> w2   (H, 1)   (PyTorch (1, H) row stored as a column)
        column  D+2     -> b2   broadcast down all H rows
    """
    H, _ = params["w1_mu"].shape

    def sample(name):
        return (params[f"{name}_mu"]
                + _softplus(params[f"{name}_rho"]) * params[f"{name}_eps"]
                ).astype(jnp.float32)

    w1 = sample("w1")                                            # (H, D)
    b1 = sample("b1").reshape(H, 1)                              # (H, 1)
    w2 = sample("w2").reshape(H, 1)                              # (H, 1)
    b2 = jnp.broadcast_to(sample("b2").reshape(1, 1), (H, 1))    # (H, 1)
    return jnp.concatenate([w1, b1, w2, b2], axis=1)             # (H, D+3)


def _bayesian_regressor_kernel(x_ref, p_ref, o_ref, *, din):
    # p_ref: (H, din+3) pre-sampled params, columns = [ w1 (din) | b1 | w2 | b2 ].
    p = p_ref[...]
    w1 = p[:, 0:din]                  # (H, din)
    b1 = p[:, din:din + 1]            # (H, 1)
    w2 = p[:, din + 1:din + 2]        # (H, 1)
    b2 = p[0:1, din + 2:din + 3]      # (1, 1)

    x = x_ref[...]                    # (din, tb)  -- batch on the lane axis

    # Layer 1 on the MXU: (H, din) @ (din, tb) -> (H, tb), fully lane-dense.
    # (If VALU has slack after profiling, this K=4 matmul could instead be 4 broadcast
    #  FMAs on the VPU -- sweep-and-measure.)
    hidden = jnp.dot(w1, x, preferred_element_type=jnp.float32) + b1
    hidden = jnp.maximum(hidden, 0.0)

    # Layer 2 (out_features == 1): VPU multiply + sublane (XLU) reduction over H.
    out = jnp.sum(hidden * w2, axis=0, keepdims=True) + b2       # (1, tb)
    o_ref[...] = out.astype(o_ref.dtype)                         # lane-dense store


def bayesian_regressor_forward(x, params, *, block_b=65536):
    """Fused forward pass of BayesianRegressor as one pallas_call.

    x: (B, D) float array; params: dict of the 12 variational tensors in PyTorch-native
    shapes.  Returns (B, 1) float32.
    """
    B, D = x.shape
    H = params["w1_mu"].shape[0]

    p = _sample_and_pack_params(params)          # (H, D+3), VMEM-resident in the kernel
    xT = x.astype(jnp.float32).T                 # (D, B): batch -> lane axis

    if B <= 4 * 128:
        # Tiny batch: one full-array tile (always a legal block shape), grid of 1.
        tb, b_padded = B, B
    else:
        # Lane-aligned tiles; at least ~4 grid steps so ("parallel",) feeds both
        # TensorCores on v7x, capped at block_b (~1 MiB of x / ~8 MiB hidden per step).
        tb = min(block_b, pl.cdiv(B, 4))
        tb = max(128, (tb // 128) * 128)
        b_padded = pl.cdiv(B, tb) * tb
        if b_padded != B:
            # Pads only a thin (D, pad) strip of zero columns (fuses with the transpose).
            xT = jnp.pad(xT, ((0, 0), (0, b_padded - B)))

    grid = (b_padded // tb,)
    kernel = functools.partial(_bayesian_regressor_kernel, din=D)

    out = pl.pallas_call(
        kernel,
        out_shape=jax.ShapeDtypeStruct((1, b_padded), jnp.float32),
        grid_spec=pltpu.PrefetchScalarGridSpec(
            num_scalar_prefetch=0,
            grid=grid,
            in_specs=[
                # Batch-tiled activations, lane-dense.  (Bump to
                # pipeline_mode=pl.Buffered(3) only if xprof shows exposed DMA.)
                pl.BlockSpec((D, tb), lambda i: (0, i)),
                # Packed sampled params stay resident across the whole grid.
                pl.BlockSpec((H, D + 3), lambda i: (0, 0)),
            ],
            out_specs=pl.BlockSpec((1, tb), lambda i: (0, i)),
        ),
        compiler_params=pltpu.CompilerParams(
            dimension_semantics=("parallel",),        # both TensorCores on v7x
            vmem_limit_bytes=48 * 1024 * 1024,        # > v5e 16 MiB scoped, < v7x 64 MiB
        ),
    )(xT, p)

    return out[0, :B].reshape(B, 1)                   # (B, 1), drops padded tail


def _reference_forward(x, p):
    """Pure-JAX reference (PyTorch-style weight layout) for correctness checking."""
    w1 = p["w1_mu"] + _softplus(p["w1_rho"]) * p["w1_eps"]
    b1 = p["b1_mu"] + _softplus(p["b1_rho"]) * p["b1_eps"]
    w2 = p["w2_mu"] + _softplus(p["w2_rho"]) * p["w2_eps"]
    b2 = p["b2_mu"] + _softplus(p["b2_rho"]) * p["b2_eps"]
    h = jnp.maximum(x @ w1.T + b1, 0.0)
    return h @ w2.T + b2


if __name__ == "__main__":
    # Small shapes consistent with the module: input_dim=4, hidden_dim=32, out=1.
    B, D, H = 8, 4, 32
    key = jax.random.PRNGKey(0)
    (k_x, k_x2,
     k_w1mu, k_w1eps, k_b1mu, k_b1eps,
     k_w2mu, k_w2eps, k_b2mu, k_b2eps) = jax.random.split(key, 10)

    x = jax.random.normal(k_x, (B, D), dtype=jnp.float32)

    # PyTorch-native parameter shapes: weight (out_features, in_features), bias (out,).
    # rho = -5.0 is the typical Bayes-by-Backprop init; eps is the per-forward noise.
    params = {
        "w1_mu":  jax.random.uniform(k_w1mu, (H, D), jnp.float32, -0.2, 0.2),
        "w1_rho": jnp.full((H, D), -5.0, jnp.float32),
        "w1_eps": jax.random.normal(k_w1eps, (H, D), jnp.float32),
        "b1_mu":  jax.random.uniform(k_b1mu, (H,), jnp.float32, -0.2, 0.2),
        "b1_rho": jnp.full((H,), -5.0, jnp.float32),
        "b1_eps": jax.random.normal(k_b1eps, (H,), jnp.float32),
        "w2_mu":  jax.random.uniform(k_w2mu, (1, H), jnp.float32, -0.2, 0.2),
        "w2_rho": jnp.full((1, H), -5.0, jnp.float32),
        "w2_eps": jax.random.normal(k_w2eps, (1, H), jnp.float32),
        "b2_mu":  jax.random.uniform(k_b2mu, (1,), jnp.float32, -0.2, 0.2),
        "b2_rho": jnp.full((1,), -5.0, jnp.float32),
        "b2_eps": jax.random.normal(k_b2eps, (1,), jnp.float32),
    }

    fwd = jax.jit(bayesian_regressor_forward)

    # Single-tile path.
    out = jax.block_until_ready(fwd(x, params))
    ref = _reference_forward(x, params)
    assert out.shape == (B, 1), out.shape
    assert jnp.allclose(out, ref, atol=1e-4, rtol=1e-4), "mismatch vs reference (small B)"

    # Multi-step "parallel" grid + ragged-tail path (B=1000 -> 8 tiles of 128, tail pad).
    B2 = 1000
    x2 = jax.random.normal(k_x2, (B2, D), dtype=jnp.float32)
    out2 = jax.block_until_ready(fwd(x2, params))
    ref2 = _reference_forward(x2, params)
    assert out2.shape == (B2, 1), out2.shape
    assert jnp.allclose(out2, ref2, atol=1e-4, rtol=1e-4), "mismatch vs reference (tiled B)"

    # TODO(synk): log_prior / log_posterior / energy_loss are training-time scalar
    # diagnostics over the variational distributions (not part of forward()); not
    # implemented in-kernel.
    print("KERNEL_OK")
</pallas_src>

<mosaic_0001>
module attributes {stable_mosaic.version = 11 : i64} {
  func.func @_bayesian_regressor_kernel(%arg0: i32, %arg1: memref<4x8xf32, #tpu.memory_space<vmem>>, %arg2: memref<32x7xf32, #tpu.memory_space<vmem>>, %arg3: memref<1x8xf32, #tpu.memory_space<vmem>>) attributes {dimension_semantics = [#tpu.dimension_semantics<parallel>], iteration_bounds = array<i64: 1>, scalar_prefetch = 0 : i64, scratch_operands = 0 : i64, tpu.core_type = #tpu.core_type<tc>, window_params = [{transform_indices = @transform_0, window_bounds = array<i64: 4, 8>}, {pipeline_mode = #tpu.pipeline_mode<synchronous>, transform_indices = @transform_1, window_bounds = array<i64: 32, 7>}, {transform_indices = @transform_2, window_bounds = array<i64: 1, 8>}]} {
    %c0 = arith.constant 0 : index
    %c0_0 = arith.constant 0 : index
    %0 = vector.load %arg2[%c0, %c0_0] : memref<32x7xf32, #tpu.memory_space<vmem>>, vector<32x7xf32>
    %1 = vector.extract_strided_slice %0 {offsets = [0, 0], sizes = [32, 4], strides = [1, 1]} : vector<32x7xf32> to vector<32x4xf32>
    %2 = vector.extract_strided_slice %0 {offsets = [0, 4], sizes = [32, 1], strides = [1, 1]} : vector<32x7xf32> to vector<32x1xf32>
    %3 = vector.extract_strided_slice %0 {offsets = [0, 5], sizes = [32, 1], strides = [1, 1]} : vector<32x7xf32> to vector<32x1xf32>
    %4 = vector.extract_strided_slice %0 {offsets = [0, 6], sizes = [1, 1], strides = [1, 1]} : vector<32x7xf32> to vector<1x1xf32>
    %c0_1 = arith.constant 0 : index
    %c0_2 = arith.constant 0 : index
    %5 = vector.load %arg1[%c0_1, %c0_2] : memref<4x8xf32, #tpu.memory_space<vmem>>, vector<4x8xf32>
    %cst = arith.constant dense<0.000000e+00> : vector<32x8xf32>
    %6 = tpu.matmul %1, %5, %cst {dimension_numbers = #tpu.dot_dimension_numbers<[1], [0], [0], [1], [0, 0, 1, 1], [], []>} : vector<32x4xf32>, vector<4x8xf32>, vector<32x8xf32> -> vector<32x8xf32>
    %7 = vector.broadcast %2 : vector<32x1xf32> to vector<32x8xf32>
    %8 = arith.addf %6, %7 : vector<32x8xf32>
    %cst_3 = arith.constant 0.000000e+00 : f32
    %9 = vector.broadcast %cst_3 : f32 to vector<32x8xf32>
    %10 = arith.maximumf %8, %9 : vector<32x8xf32>
    %11 = vector.broadcast %3 : vector<32x1xf32> to vector<32x8xf32>
    %12 = arith.mulf %10, %11 : vector<32x8xf32>
    %cst_4 = arith.constant dense<0.000000e+00> : vector<8xf32>
    %13 = vector.multi_reduction <add>, %12, %cst_4 [0] : vector<32x8xf32> to vector<8xf32>
    %14 = vector.shape_cast %13 : vector<8xf32> to vector<1x8xf32>
    %15 = vector.broadcast %4 : vector<1x1xf32> to vector<1x8xf32>
    %16 = arith.addf %14, %15 : vector<1x8xf32>
    %c0_5 = arith.constant 0 : index
    %c0_6 = arith.constant 0 : index
    %17 = vector.load %arg3[%c0_5, %c0_6] : memref<1x8xf32, #tpu.memory_space<vmem>>, vector<1x8xf32>
    tpu.vector_store %arg3[%c0_5, %c0_6], %16 {strides = array<i32>} : memref<1x8xf32, #tpu.memory_space<vmem>>, vector<1x8xf32>,
    return
  }
  func.func @transform_0(%arg0: i32) -> (i32, i32) {
    %c0_i32 = arith.constant 0 : i32
    %c0_i32_0 = arith.constant 0 : i32
    return %c0_i32, %arg0 : i32, i32
  }
  func.func @transform_1(%arg0: i32) -> (i32, i32) {
    %c0_i32 = arith.constant 0 : i32
    %c0_i32_0 = arith.constant 0 : i32
    %c0_i32_1 = arith.constant 0 : i32
    return %c0_i32, %c0_i32_0 : i32, i32
  }
  func.func @transform_2(%arg0: i32) -> (i32, i32) {
    %c0_i32 = arith.constant 0 : i32
    %c0_i32_0 = arith.constant 0 : i32
    return %c0_i32, %arg0 : i32, i32
  }
}

</mosaic_0001>

<bundles_post_ra>
// kernel: bayesian_regressor_forward.1
= control target key start
LH: loop header
LB: loop body
LE: loop exit
PB: predicated region body
PF: predicated region fallthrough
CT: control target
= control target key end

     0   :  { %vm46_vm0 = vcmask 1043456   ;;  %v185_v1 = vmov 4   ;;  %vm37_vm1 = vcmask 31744   ;;  %s226_s0 = inlined_call_operand.vmem [shape: f32[4,8], index: 0, kind: input, shape index: {}]   ;;  %s227_s1 = inlined_call_operand.vmem [shape: f32[32,7], index: 1, kind: input, shape index: {}]   ;;  %s228_s2 = inlined_call_operand.hbm [shape: f32[1,8], index: 2, kind: output, shape index: {}]  }
   0x1   :  { %v16_v0 = vld [vmem:[%s226_s0] sm:$0xf]  ;;  %153 = vset.pattern.permute.xlu1 %v185_v1  ;;  %152 = vset.pattern.permute.xlu0 %v185_v1  ;;  %v15_v2 = vld [vmem:[%s227_s1 + $0x18] sm:$0xff]  ;;  %v14_v3 = vld [vmem:[%s227_s1 + $0x10] sm:$0xff] }
   0x2   :  { %140 = vmatpush.msk.msra.mxu0 %vm46_vm0, %v16_v0  ;;  %145 = vmatpush.msk.msra.mxu1 %vm46_vm0, %v16_v0  ;;  %v13_v4 = vld [vmem:[%s227_s1 + $0x8] sm:$0xff] }
   0x3   :  { %7 = vsyncpa [#allocation3], 0  ;;  %146 = vmatpush.msk.msra.mxu2 %vm46_vm0, %v16_v0  ;;  %147 = vmatpush.msk.msra.mxu3 %vm46_vm0, %v16_v0  ;;  %v12_v5 = vld [vmem:[%s227_s1] sm:$0xff]  ;;  %v186_v6 = vmov 5   ;;  %v187_v7 = vmov 6   ;;  %vm103_vm2 = vcmask 64512  }
   0x4   :  { %144 = vmatmul.msk.f32.vlgmr.msra.gmra.mxu3 %vm37_vm1, %v15_v2  ;;  %29 = vperm.xlu1 %153, %v14_v3   ;;  %s188_s1 = smov [#allocation2]   ;;  %s131_s21 = sshll.u32 %s228_s2, 4  ;;  %vm122_vm3 = vcmask 57344   ;;  %s132_s21 = int_to_ptr.hbm [resolvable:$true] %s131_s21 }
   0x5   :  { %142 = vmatmul.msk.f32.vlgmr.msra.gmra.mxu1 %vm37_vm1, %v13_v4  ;;  %143 = vmatmul.msk.f32.vlgmr.msra.gmra.mxu2 %vm37_vm1, %v14_v3  ;;  %s129_s18 = sshll.u32 %s188_s1, 4  ;;  %s130_s18 = int_to_ptr.vmem [resolvable:$true] %s129_s18 }
   0x6   :  { %19 = vperm.xlu0 %152, %v12_v5   ;;  %141 = vmatmul.msk.f32.vlgmr.msra.gmra.mxu0 %vm37_vm1, %v12_v5 }
   0x7   :  { %154 = vset.pattern.permute.xlu2 %v186_v6 }
   0x8   :  { %84 = vperm.xlu2 %154, %v12_v5  }
   0xc   :  { %34 = vperm.xlu1 %153, %v15_v2  }
   0xe   :  { %24 = vperm.xlu0 %152, %v13_v4  }
  0x10   :  { %88 = vperm.xlu2 %154, %v13_v4  }
  0x14   :  { %156 = vset.pattern.permute.xlu1 %v186_v6 }
  0x15   :  { %96 = vperm.xlu1 %156, %v15_v2  }
  0x16   :  { %155 = vset.pattern.permute.xlu0 %v186_v6 }
  0x17   :  { %92 = vperm.xlu0 %155, %v14_v3  }
  0x18   :  { %157 = vset.pattern.permute.xlu2 %v187_v7 }
  0x19   :  { %118 = vperm.xlu2 %157, %v12_v5  }
  0x1f   :  { %158 = vset.pattern.permute.xlu0 %v187_v7 }
  0x62   :  { %v85_v10 = vpop.permute.xlu2 %84 }
  0x6a   :  { %v89_v18 = vpop.permute.xlu2 %88 }
  0x73   :  { %v119_v44 = vpop.permute.xlu2 %118 }
  0x76   :  { %v30_v8 = vpop.permute.xlu1 %29 }
  0x78   :  { %v20_v9 = vpop.permute.xlu0 %19 }
  0x7e   :  { %v35_v11 = vpop.permute.xlu1 %34 }
  0x80   :  { %v25_v12 = vpop.permute.xlu0 %24 }
  0x82   :  { %v70_v13 = vpop.f32.mrf.mxu1 }
  0x83   :  { %v71_v14 = vadd.f32 %v70_v13, %v25_v12  ;;  %v67_v15 = vpop.f32.mrf.mxu0 }
  0x84   :  { %v68_v16 = vadd.f32 %v67_v15, %v20_v9 }
  0x85   :  { %v80_v17 = vmax.f32 %v71_v14, 0.0 }
  0x86   :  { %v79_v19 = vmax.f32 %v68_v16, 0.0 }
  0x87   :  { %v100_v20 = vmul.f32 %v89_v18, %v80_v17  ;;  %v76_v21 = vpop.f32.mrf.mxu3  ;;  %v97_v27 = vpop.permute.xlu1 %96 }
  0x88   :  { %v99_v22 = vmul.f32 %v85_v10, %v79_v19  ;;  %v73_v23 = vpop.f32.mrf.mxu2  ;;  %v77_v24 = vadd.f32 %v76_v21, %v35_v11 }
  0x89   :  { %v74_v25 = vadd.f32 %v73_v23, %v30_v8  ;;  %v93_v28 = vpop.permute.xlu0 %92  ;;  %v105_v29 = vsel %vm103_vm2, %v100_v20, 0.0 }
  0x8a   :  { %v82_v26 = vmax.f32 %v77_v24, 0.0  ;;  %v104_v30 = vsel %vm103_vm2, %v99_v22, 0.0 }
  0x8b   :  { %v81_v31 = vmax.f32 %v74_v25, 0.0  ;;  %v106_v34 = vadd.f32 %v105_v29, %v104_v30 }
  0x8c   :  { %v102_v32 = vmul.f32 %v97_v27, %v82_v26 }
  0x8d   :  { %v101_v33 = vmul.f32 %v93_v28, %v81_v31 }
  0x8e   :  { %v109_v37 = vsel %vm103_vm2, %v102_v32, 0.0 }
  0x8f   :  { %v107_v35 = vsel %vm103_vm2, %v101_v33, 0.0 }
  0x90   :  { %v108_v36 = vadd.f32 %v107_v35, %v106_v34 }
  0x92   :  { %v110_v38 = vadd.f32 %v109_v37, %v108_v36 }
  0x94   :  { %v111_v39 = vrot.slane %v110_v38, 4 }
  0x96   :  { %v112_v40 = vadd.f32 %v111_v39, %v110_v38 }
  0x98   :  { %v113_v41 = vrot.slane %v112_v40, 2 }
  0x9a   :  { %v114_v42 = vadd.f32 %v113_v41, %v112_v40 }
  0x9c   :  { %v115_v43 = vrot.slane %v114_v42, 1 }
  0x9e   :  { %v116_v45 = vadd.f32 %v115_v43, %v114_v42 }
  0xa0   :  { %v121_v46 = vadd.f32 %v119_v44, %v116_v45 }
  0xa2   :  { %123 = vst.msk [vmem:[#allocation2] sm:$0x1] %vm122_vm3, %v121_v46 }
  0xa3   :  { %134 = dma.vmem_to_hbm [thread:$0]  %s130_s18, 16, %s132_s21, [#allocation3]  }
  0xa4   :  { %183 = dma.done.wait [#allocation3], 16  }
  0xa5   :  { %184 = vsyncadd [#allocation3], 4294967280 }
  0xa6   :  { %139 = vsyncpa [#allocation3], 1 }

</bundles_post_ra>
